<compile_context>
chip_gen: v5e
topology: v5e:2x2
jax: 0.10.0
libtpu: 0.0.40
codegen_flags: <defaults>
</compile_context>

<pallas_src>
import functools

import jax
import jax.numpy as jnp
from jax import lax
from jax.experimental import pallas as pl
from jax.experimental.pallas import tpu as pltpu


# -----------------------------------------------------------------------------
# Stage 1: SAGE aggregation + fused feat/pool fc + softmax + block-diagonal S
# -----------------------------------------------------------------------------
def _sage_assign_kernel(a_ref, hk_ref, hi_ref, m_ref, wc_ref, bc_ref,
                        feat_ref, s_ref, acc_ref, deg_ref, *, D):
    k = pl.program_id(1)

    @pl.when(k == 0)
    def _():
        acc_ref[...] = jnp.zeros_like(acc_ref)
        deg_ref[...] = jnp.zeros_like(deg_ref)

    a = a_ref[...]                                                # (tm, tk) bf16, 0/1 exact
    acc_ref[...] += jnp.dot(a, hk_ref[...],
                            preferred_element_type=jnp.float32)   # bf16 MXU, f32 acc
    # Degree: lane-axis reduce goes to the XLU slot -> free under the MXU matmul.
    deg_ref[...] += jnp.sum(a.astype(jnp.float32), axis=1, keepdims=True)

    @pl.when(k == pl.num_programs(1) - 1)
    def _():
        # (A @ H + H) / (deg + 1): divide -> EUP reciprocal + multiply
        inv = pl.reciprocal(deg_ref[...] + 1.0, approx=True)
        h_neigh = (acc_ref[...] + hi_ref[...].astype(jnp.float32)) * inv  # (tm, F_in) f32

        # One fc for both convs: W_cat = [Wf | Wp] -> (tm, 2D), then ReLU
        z = jnp.dot(h_neigh.astype(jnp.bfloat16), wc_ref[...],
                    preferred_element_type=jnp.float32) + bc_ref[...]
        z = jnp.maximum(z, 0.0)
        feat = z[:, :D]
        logits = z[:, D:]

        # softmax over the cluster dimension (dim=1)
        logits = logits - jnp.max(logits, axis=1, keepdims=True)
        e = jnp.exp(logits)
        assign = e * pl.reciprocal(jnp.sum(e, axis=1, keepdims=True), approx=True)

        # block-diagonal assignment rows: tile across graphs, mask columns
        B = m_ref.shape[1] // D
        s_bd = jnp.tile(assign, (1, B)) * m_ref[...].astype(jnp.float32)  # (tm, B*D)

        feat_ref[...] = feat.astype(feat_ref.dtype)
        s_ref[...] = s_bd.astype(s_ref.dtype)


# -----------------------------------------------------------------------------
# Stage 2: pooled adjacency / pooled features (per-row-tile partials)
#   adj_new = S^T A^T S = sum_j (A S)_j^T S_j       h_pool = sum_j S_j^T feat_j
# -----------------------------------------------------------------------------
def _pool_kernel(a_ref, sk_ref, sj_ref, fj_ref, adj_ref, hp_ref, accq_ref):
    k = pl.program_id(1)

    @pl.when(k == 0)
    def _():
        accq_ref[...] = jnp.zeros_like(accq_ref)

    # Q_j += A[tile_j, tile_k] @ S[tile_k]        (tm, B*D)
    accq_ref[...] += jnp.dot(a_ref[...], sk_ref[...],
                             preferred_element_type=jnp.float32)

    @pl.when(k == pl.num_programs(1) - 1)
    def _():
        sj = sj_ref[...]                                          # (tm, B*D) bf16
        # adj_partial[j] = Q_j^T @ S_j      (contract the node/tile dim)
        adj_ref[0] = lax.dot_general(
            accq_ref[...].astype(jnp.bfloat16), sj,
            (((0,), (0,)), ((), ())), preferred_element_type=jnp.float32)
        # h_pool_partial[j] = S_j^T @ feat_j
        hp_ref[0] = lax.dot_general(
            sj, fj_ref[...],
            (((0,), (0,)), ((), ())), preferred_element_type=jnp.float32)


# -----------------------------------------------------------------------------
# Wrapper
# -----------------------------------------------------------------------------
def _round_up(x, m):
    return ((x + m - 1) // m) * m


def _node_tiles(N):
    """Pick (padded_N, row_tile, col_tile) honoring the TPU (8,128) block rules."""
    if N > 512:
        tk = 512                         # contraction tile: multiple of 128
        Np = _round_up(N, tk)
        tm = 256                         # row tile: multiple of 8, divides Np
    else:
        Np = _round_up(N, 8)
        tk = Np                          # small graphs: full-width column tile
        half = Np // 2
        tm = half if (half > 0 and half % 8 == 0) else Np
    return Np, tm, tk


def diffpool_forward(A, H, Wf, bf, Wp, bp, seg_ids, num_graphs):
    N, F_in = H.shape
    D = Wf.shape[1]
    B = int(num_graphs)
    BD = B * D

    Np, tm, tk = _node_tiles(N)
    pad = Np - N

    # bf16 MXU operands (A is 0/1 -> exact cast); f32 accumulation in-kernel.
    A_p = jnp.pad(A, ((0, pad), (0, pad))).astype(jnp.bfloat16)
    H_p = jnp.pad(H, ((0, pad), (0, 0))).astype(jnp.bfloat16)

    # Block-diagonal column mask: mask[i, b*D + d] = 1 iff node i belongs to graph b.
    # bf16 halves its HBM traffic; values are exactly 0/1.
    onehot = jax.nn.one_hot(seg_ids, B, dtype=jnp.float32)        # (N, B)
    mask = jnp.repeat(onehot, D, axis=1)                          # (N, B*D)
    mask = jnp.pad(mask, ((0, pad), (0, 0))).astype(jnp.bfloat16)

    W_cat = jnp.concatenate([Wf, Wp], axis=1).astype(jnp.bfloat16)      # (F_in, 2D)
    b_cat = jnp.concatenate([bf, bp]).reshape(1, 2 * D).astype(jnp.float32)

    gi, gk = Np // tm, Np // tk

    cost1 = pl.CostEstimate(
        flops=2 * Np * Np * F_in + 2 * Np * F_in * 2 * D + 8 * Np * (F_in + 2 * D),
        transcendentals=Np * (D + 2),
        bytes_accessed=2 * Np * Np + 4 * Np * F_in + 2 * Np * BD
                       + 4 * F_in * D + 2 * Np * (D + BD))

    feat, s_bd = pl.pallas_call(
        functools.partial(_sage_assign_kernel, D=D),
        out_shape=(jax.ShapeDtypeStruct((Np, D), jnp.bfloat16),
                   jax.ShapeDtypeStruct((Np, BD), jnp.bfloat16)),
        grid=(gi, gk),
        in_specs=[
            pl.BlockSpec((tm, tk), lambda i, k: (i, k)),          # A tile
            pl.BlockSpec((tk, F_in), lambda i, k: (k, 0)),        # H rows (contraction)
            pl.BlockSpec((tm, F_in), lambda i, k: (i, 0)),        # H rows (self term)
            pl.BlockSpec((tm, BD), lambda i, k: (i, 0)),          # block-diag mask
            pl.BlockSpec((F_in, 2 * D), lambda i, k: (0, 0)),     # [Wf | Wp]
            pl.BlockSpec((1, 2 * D), lambda i, k: (0, 0)),        # [bf | bp]
        ],
        out_specs=(pl.BlockSpec((tm, D), lambda i, k: (i, 0)),
                   pl.BlockSpec((tm, BD), lambda i, k: (i, 0))),
        scratch_shapes=[pltpu.VMEM((tm, F_in), jnp.float32),
                        pltpu.VMEM((tm, 1), jnp.float32)],
        compiler_params=pltpu.CompilerParams(
            dimension_semantics=("parallel", "arbitrary"),
            vmem_limit_bytes=64 * 1024 * 1024),
        cost_estimate=cost1,
    )(A_p, H_p, H_p, mask, W_cat, b_cat)

    cost2 = pl.CostEstimate(
        flops=2 * Np * Np * BD + 2 * Np * BD * BD + 2 * Np * BD * D,
        transcendentals=0,
        bytes_accessed=2 * Np * Np + 2 * (gi + 1) * Np * BD + 2 * Np * D
                       + 4 * gi * BD * (BD + D))

    adj_part, hp_part = pl.pallas_call(
        _pool_kernel,
        out_shape=(jax.ShapeDtypeStruct((gi, BD, BD), jnp.float32),
                   jax.ShapeDtypeStruct((gi, BD, D), jnp.float32)),
        grid=(gi, gk),
        in_specs=[
            pl.BlockSpec((tm, tk), lambda j, k: (j, k)),          # A tile
            pl.BlockSpec((tk, BD), lambda j, k: (k, 0)),          # S rows (contraction)
            pl.BlockSpec((tm, BD), lambda j, k: (j, 0)),          # S rows (outer)
            pl.BlockSpec((tm, D), lambda j, k: (j, 0)),           # feat rows
        ],
        out_specs=(pl.BlockSpec((1, BD, BD), lambda j, k: (j, 0, 0)),
                   pl.BlockSpec((1, BD, D), lambda j, k: (j, 0, 0))),
        scratch_shapes=[pltpu.VMEM((tm, BD), jnp.float32)],
        compiler_params=pltpu.CompilerParams(
            dimension_semantics=("parallel", "arbitrary"),
            vmem_limit_bytes=64 * 1024 * 1024),
        cost_estimate=cost2,
    )(A_p, s_bd, s_bd, feat)

    # Tiny partial-sum reduction in XLA (keeps the j axis core-parallel in-kernel).
    adj_new = adj_part.sum(axis=0)
    h_pool = hp_part.sum(axis=0)
    return adj_new, h_pool


# -----------------------------------------------------------------------------
# Pure-JAX reference mirroring the PyTorch forward (eval mode, f32)
# -----------------------------------------------------------------------------
def reference(A, H, Wf, bf, Wp, bp, batch_num_nodes):
    deg = A.sum(axis=1, keepdims=True)
    hn = (A @ H + H) / (deg + 1.0)
    feat = jax.nn.relu(hn @ Wf + bf)
    assign = jax.nn.softmax(jax.nn.relu(hn @ Wp + bp), axis=1)
    N = A.shape[0]
    D = Wf.shape[1]
    B = len(batch_num_nodes)
    bd = jnp.zeros((N, B * D), jnp.float32)       # torch.block_diag of per-graph splits
    row = 0
    for b, n in enumerate(batch_num_nodes):
        bd = bd.at[row:row + n, b * D:(b + 1) * D].set(assign[row:row + n])
        row += n
    h_out = bd.T @ feat
    adj_new = bd.T @ (A.T @ bd)                   # adjacency_matrix(transpose=True)
    return adj_new, h_out


if __name__ == "__main__":
    key = jax.random.PRNGKey(0)
    input_dim = 16
    output_feat_dim = 8               # D (pool_gc also uses output_feat_dim in the ref)
    batch_num_nodes = [10, 6]         # batched graph: 2 graphs, 16 nodes total
    B = len(batch_num_nodes)
    N = sum(batch_num_nodes)
    D = output_feat_dim

    k_adj, k_h, k_wf, k_bf, k_wp, k_bp = jax.random.split(key, 6)

    # Block-diagonal (batched) symmetric adjacency, deterministic.
    A = jnp.zeros((N, N), jnp.float32)
    off = 0
    for i, n in enumerate(batch_num_nodes):
        sub = (jax.random.uniform(jax.random.fold_in(k_adj, i), (n, n)) < 0.4)
        sub = sub.astype(jnp.float32)
        sub = jnp.maximum(sub, sub.T)
        A = A.at[off:off + n, off:off + n].set(sub)
        off += n

    H = jax.random.normal(k_h, (N, input_dim), jnp.float32)
    Wf = jax.random.normal(k_wf, (input_dim, D), jnp.float32) * 0.2
    bf = jax.random.normal(k_bf, (D,), jnp.float32) * 0.1
    Wp = jax.random.normal(k_wp, (input_dim, D), jnp.float32) * 0.2
    bp = jax.random.normal(k_bp, (D,), jnp.float32) * 0.1

    seg_ids = jnp.concatenate(
        [jnp.full((n,), i, jnp.int32) for i, n in enumerate(batch_num_nodes)])

    adj_new, h_pool = diffpool_forward(A, H, Wf, bf, Wp, bp, seg_ids, B)
    adj_new = jax.block_until_ready(adj_new)
    h_pool = jax.block_until_ready(h_pool)

    adj_ref, h_ref = reference(A, H, Wf, bf, Wp, bp, batch_num_nodes)

    assert adj_new.shape == (B * D, B * D) and h_pool.shape == (B * D, D)
    # bf16 MXU operands + approx reciprocals -> compare against the f32 reference
    # with a slightly widened (but still tight) tolerance.
    assert jnp.allclose(adj_new, adj_ref, rtol=2e-2, atol=2e-2)
    assert jnp.allclose(h_pool, h_ref, rtol=2e-2, atol=2e-2)

    print("KERNEL_OK")
</pallas_src>

<mosaic_0001>
module attributes {stable_mosaic.version = 11 : i64} {
  func.func @_sage_assign_kernel(%arg0: i32, %arg1: i32, %arg2: memref<8x16xbf16, #tpu.memory_space<vmem>>, %arg3: memref<16x16xbf16, #tpu.memory_space<vmem>>, %arg4: memref<8x16xbf16, #tpu.memory_space<vmem>>, %arg5: memref<8x16xbf16, #tpu.memory_space<vmem>>, %arg6: memref<16x16xbf16, #tpu.memory_space<vmem>>, %arg7: memref<1x16xf32, #tpu.memory_space<vmem>>, %arg8: memref<8x8xbf16, #tpu.memory_space<vmem>>, %arg9: memref<8x16xbf16, #tpu.memory_space<vmem>>, %arg10: memref<8x16xf32, #tpu.memory_space<vmem>>, %arg11: memref<8x1xf32, #tpu.memory_space<vmem>>) attributes {dimension_semantics = [#tpu.dimension_semantics<parallel>, #tpu.dimension_semantics<arbitrary>], iteration_bounds = array<i64: 2, 1>, scalar_prefetch = 0 : i64, scratch_operands = 2 : i64, tpu.core_type = #tpu.core_type<tc>, window_params = [{transform_indices = @transform_0, window_bounds = array<i64: 8, 16>}, {transform_indices = @transform_1, window_bounds = array<i64: 16, 16>}, {transform_indices = @transform_2, window_bounds = array<i64: 8, 16>}, {transform_indices = @transform_3, window_bounds = array<i64: 8, 16>}, {pipeline_mode = #tpu.pipeline_mode<synchronous>, transform_indices = @transform_4, window_bounds = array<i64: 16, 16>}, {pipeline_mode = #tpu.pipeline_mode<synchronous>, transform_indices = @transform_5, window_bounds = array<i64: 1, 16>}, {transform_indices = @transform_6, window_bounds = array<i64: 8, 8>}, {transform_indices = @transform_7, window_bounds = array<i64: 8, 16>}]} {
    %c0_i32 = arith.constant 0 : i32
    %0 = arith.cmpi eq, %arg1, %c0_i32 : i32
    %1 = arith.extui %0 : i1 to i32
    %c0_i32_0 = arith.constant 0 : i32
    %2 = arith.cmpi ne, %1, %c0_i32_0 : i32
    scf.if %2 {
      %cst_15 = arith.constant 0.000000e+00 : f32
      %18 = vector.broadcast %cst_15 : f32 to vector<8x16xf32>
      %c0_16 = arith.constant 0 : index
      %c0_17 = arith.constant 0 : index
      %19 = vector.load %arg10[%c0_16, %c0_17] : memref<8x16xf32, #tpu.memory_space<vmem>>, vector<8x16xf32>
      tpu.vector_store %arg10[%c0_16, %c0_17], %18 {strides = array<i32>} : memref<8x16xf32, #tpu.memory_space<vmem>>, vector<8x16xf32>,
      %cst_18 = arith.constant 0.000000e+00 : f32
      %20 = vector.broadcast %cst_18 : f32 to vector<8x1xf32>
      %c0_19 = arith.constant 0 : index
      %c0_20 = arith.constant 0 : index
      %21 = vector.load %arg11[%c0_19, %c0_20] : memref<8x1xf32, #tpu.memory_space<vmem>>, vector<8x1xf32>
      tpu.vector_store %arg11[%c0_19, %c0_20], %20 {strides = array<i32>} : memref<8x1xf32, #tpu.memory_space<vmem>>, vector<8x1xf32>,
    } else {
    }
    %c0 = arith.constant 0 : index
    %c0_1 = arith.constant 0 : index
    %3 = vector.load %arg2[%c0, %c0_1] : memref<8x16xbf16, #tpu.memory_space<vmem>>, vector<8x16xbf16>
    %c0_2 = arith.constant 0 : index
    %c0_3 = arith.constant 0 : index
    %4 = vector.load %arg10[%c0_2, %c0_3] : memref<8x16xf32, #tpu.memory_space<vmem>>, vector<8x16xf32>
    %c0_4 = arith.constant 0 : index
    %c0_5 = arith.constant 0 : index
    %5 = vector.load %arg3[%c0_4, %c0_5] : memref<16x16xbf16, #tpu.memory_space<vmem>>, vector<16x16xbf16>
    %cst = arith.constant dense<0.000000e+00> : vector<8x16xf32>
    %6 = tpu.matmul %3, %5, %cst {dimension_numbers = #tpu.dot_dimension_numbers<[1], [0], [0], [1], [0, 0, 1, 1], [], []>} : vector<8x16xbf16>, vector<16x16xbf16>, vector<8x16xf32> -> vector<8x16xf32>
    %7 = arith.addf %4, %6 : vector<8x16xf32>
    %c0_6 = arith.constant 0 : index
    %c0_7 = arith.constant 0 : index
    %8 = vector.load %arg10[%c0_6, %c0_7] : memref<8x16xf32, #tpu.memory_space<vmem>>, vector<8x16xf32>
    tpu.vector_store %arg10[%c0_6, %c0_7], %7 {strides = array<i32>} : memref<8x16xf32, #tpu.memory_space<vmem>>, vector<8x16xf32>,
    %c0_8 = arith.constant 0 : index
    %c0_9 = arith.constant 0 : index
    %9 = vector.load %arg11[%c0_8, %c0_9] : memref<8x1xf32, #tpu.memory_space<vmem>>, vector<8x1xf32>
    %10 = arith.extf %3 : vector<8x16xbf16> to vector<8x16xf32>
    %cst_10 = arith.constant dense<0.000000e+00> : vector<8xf32>
    %11 = vector.multi_reduction <add>, %10, %cst_10 [1] : vector<8x16xf32> to vector<8xf32>
    %12 = vector.shape_cast %11 : vector<8xf32> to vector<8x1xf32>
    %13 = arith.addf %9, %12 : vector<8x1xf32>
    %c0_11 = arith.constant 0 : index
    %c0_12 = arith.constant 0 : index
    %14 = vector.load %arg11[%c0_11, %c0_12] : memref<8x1xf32, #tpu.memory_space<vmem>>, vector<8x1xf32>
    tpu.vector_store %arg11[%c0_11, %c0_12], %13 {strides = array<i32>} : memref<8x1xf32, #tpu.memory_space<vmem>>, vector<8x1xf32>,
    %c0_i32_13 = arith.constant 0 : i32
    %15 = arith.cmpi eq, %arg1, %c0_i32_13 : i32
    %16 = arith.extui %15 : i1 to i32
    %c0_i32_14 = arith.constant 0 : i32
    %17 = arith.cmpi ne, %16, %c0_i32_14 : i32
    scf.if %17 {
      %c0_15 = arith.constant 0 : index
      %c0_16 = arith.constant 0 : index
      %18 = vector.load %arg11[%c0_15, %c0_16] : memref<8x1xf32, #tpu.memory_space<vmem>>, vector<8x1xf32>
      %cst_17 = arith.constant 1.000000e+00 : f32
      %19 = vector.broadcast %cst_17 : f32 to vector<8x1xf32>
      %20 = arith.addf %18, %19 : vector<8x1xf32>
      %21 = tpu.reciprocal %20 {approx = true} : vector<8x1xf32> -> vector<8x1xf32>
      %c0_18 = arith.constant 0 : index
      %c0_19 = arith.constant 0 : index
      %22 = vector.load %arg10[%c0_18, %c0_19] : memref<8x16xf32, #tpu.memory_space<vmem>>, vector<8x16xf32>
      %c0_20 = arith.constant 0 : index
      %c0_21 = arith.constant 0 : index
      %23 = vector.load %arg4[%c0_20, %c0_21] : memref<8x16xbf16, #tpu.memory_space<vmem>>, vector<8x16xbf16>
      %24 = arith.extf %23 : vector<8x16xbf16> to vector<8x16xf32>
      %25 = arith.addf %22, %24 : vector<8x16xf32>
      %26 = vector.broadcast %21 : vector<8x1xf32> to vector<8x16xf32>
      %27 = arith.mulf %25, %26 : vector<8x16xf32>
      %28 = arith.truncf %27 : vector<8x16xf32> to vector<8x16xbf16>
      %c0_22 = arith.constant 0 : index
      %c0_23 = arith.constant 0 : index
      %29 = vector.load %arg6[%c0_22, %c0_23] : memref<16x16xbf16, #tpu.memory_space<vmem>>, vector<16x16xbf16>
      %cst_24 = arith.constant dense<0.000000e+00> : vector<8x16xf32>
      %30 = tpu.matmul %28, %29, %cst_24 {dimension_numbers = #tpu.dot_dimension_numbers<[1], [0], [0], [1], [0, 0, 1, 1], [], []>} : vector<8x16xbf16>, vector<16x16xbf16>, vector<8x16xf32> -> vector<8x16xf32>
      %c0_25 = arith.constant 0 : index
      %c0_26 = arith.constant 0 : index
      %31 = vector.load %arg7[%c0_25, %c0_26] : memref<1x16xf32, #tpu.memory_space<vmem>>, vector<1x16xf32>
      %32 = vector.broadcast %31 : vector<1x16xf32> to vector<8x16xf32>
      %33 = arith.addf %30, %32 : vector<8x16xf32>
      %cst_27 = arith.constant 0.000000e+00 : f32
      %34 = vector.broadcast %cst_27 : f32 to vector<8x16xf32>
      %35 = arith.maximumf %33, %34 : vector<8x16xf32>
      %36 = vector.extract_strided_slice %35 {offsets = [0, 0], sizes = [8, 8], strides = [1, 1]} : vector<8x16xf32> to vector<8x8xf32>
      %37 = vector.extract_strided_slice %35 {offsets = [0, 8], sizes = [8, 8], strides = [1, 1]} : vector<8x16xf32> to vector<8x8xf32>
      %cst_28 = arith.constant dense<0xFF800000> : vector<8xf32>
      %38 = vector.multi_reduction <maximumf>, %37, %cst_28 [1] : vector<8x8xf32> to vector<8xf32>
      %39 = vector.shape_cast %38 : vector<8xf32> to vector<8x1xf32>
      %40 = vector.broadcast %39 : vector<8x1xf32> to vector<8x8xf32>
      %41 = arith.subf %37, %40 : vector<8x8xf32>
      %42 = math.exp %41 : vector<8x8xf32>
      %cst_29 = arith.constant dense<0.000000e+00> : vector<8xf32>
      %43 = vector.multi_reduction <add>, %42, %cst_29 [1] : vector<8x8xf32> to vector<8xf32>
      %44 = vector.shape_cast %43 : vector<8xf32> to vector<8x1xf32>
      %45 = tpu.reciprocal %44 {approx = true} : vector<8x1xf32> -> vector<8x1xf32>
      %46 = vector.broadcast %45 : vector<8x1xf32> to vector<8x8xf32>
      %47 = arith.mulf %42, %46 : vector<8x8xf32>
      %48 = tpu.concatenate %47, %47 in 1 : vector<8x8xf32>, vector<8x8xf32> -> vector<8x16xf32>
      %c0_30 = arith.constant 0 : index
      %c0_31 = arith.constant 0 : index
      %49 = vector.load %arg5[%c0_30, %c0_31] : memref<8x16xbf16, #tpu.memory_space<vmem>>, vector<8x16xbf16>
      %50 = arith.extf %49 : vector<8x16xbf16> to vector<8x16xf32>
      %51 = arith.mulf %48, %50 : vector<8x16xf32>
      %52 = arith.truncf %36 : vector<8x8xf32> to vector<8x8xbf16>
      %c0_32 = arith.constant 0 : index
      %c0_33 = arith.constant 0 : index
      %53 = vector.load %arg8[%c0_32, %c0_33] : memref<8x8xbf16, #tpu.memory_space<vmem>>, vector<8x8xbf16>
      tpu.vector_store %arg8[%c0_32, %c0_33], %52 {strides = array<i32>} : memref<8x8xbf16, #tpu.memory_space<vmem>>, vector<8x8xbf16>,
      %54 = arith.truncf %51 : vector<8x16xf32> to vector<8x16xbf16>
      %c0_34 = arith.constant 0 : index
      %c0_35 = arith.constant 0 : index
      %55 = vector.load %arg9[%c0_34, %c0_35] : memref<8x16xbf16, #tpu.memory_space<vmem>>, vector<8x16xbf16>
      tpu.vector_store %arg9[%c0_34, %c0_35], %54 {strides = array<i32>} : memref<8x16xbf16, #tpu.memory_space<vmem>>, vector<8x16xbf16>,
    } else {
    }
    return
  }
  func.func @transform_0(%arg0: i32, %arg1: i32) -> (i32, i32) {
    %c0_i32 = arith.constant 0 : i32
    return %arg0, %arg1 : i32, i32
  }
  func.func @transform_1(%arg0: i32, %arg1: i32) -> (i32, i32) {
    %c0_i32 = arith.constant 0 : i32
    %c0_i32_0 = arith.constant 0 : i32
    return %arg1, %c0_i32 : i32, i32
  }
  func.func @transform_2(%arg0: i32, %arg1: i32) -> (i32, i32) {
    %c0_i32 = arith.constant 0 : i32
    %c0_i32_0 = arith.constant 0 : i32
    return %arg0, %c0_i32 : i32, i32
  }
  func.func @transform_3(%arg0: i32, %arg1: i32) -> (i32, i32) {
    %c0_i32 = arith.constant 0 : i32
    %c0_i32_0 = arith.constant 0 : i32
    return %arg0, %c0_i32 : i32, i32
  }
  func.func @transform_4(%arg0: i32, %arg1: i32) -> (i32, i32) {
    %c0_i32 = arith.constant 0 : i32
    %c0_i32_0 = arith.constant 0 : i32
    %c0_i32_1 = arith.constant 0 : i32
    return %c0_i32, %c0_i32_0 : i32, i32
  }
  func.func @transform_5(%arg0: i32, %arg1: i32) -> (i32, i32) {
    %c0_i32 = arith.constant 0 : i32
    %c0_i32_0 = arith.constant 0 : i32
    %c0_i32_1 = arith.constant 0 : i32
    return %c0_i32, %c0_i32_0 : i32, i32
  }
  func.func @transform_6(%arg0: i32, %arg1: i32) -> (i32, i32) {
    %c0_i32 = arith.constant 0 : i32
    %c0_i32_0 = arith.constant 0 : i32
    return %arg0, %c0_i32 : i32, i32
  }
  func.func @transform_7(%arg0: i32, %arg1: i32) -> (i32, i32) {
    %c0_i32 = arith.constant 0 : i32
    %c0_i32_0 = arith.constant 0 : i32
    return %arg0, %c0_i32 : i32, i32
  }
}

</mosaic_0001>

<bundles_post_ra>
// kernel: tpu_custom_call.1
= control target key start
LH: loop header
LB: loop body
LE: loop exit
PB: predicated region body
PF: predicated region fallthrough
CT: control target
= control target key end

     0   :  { %s1406_s0 = inlined_call_operand.hbm [shape: bf16[16,16], index: 0, kind: input, shape index: {}]   ;;  %s1407_s1 = inlined_call_operand.hbm [shape: bf16[16,16], index: 1, kind: input, shape index: {}]   ;;  %s1408_s2 = inlined_call_operand.hbm [shape: bf16[16,16], index: 2, kind: input, shape index: {}]   ;;  %s1409_s3 = inlined_call_operand.hbm [shape: bf16[16,16], index: 3, kind: input, shape index: {}]   ;;  %s1410_s4 = inlined_call_operand.hbm [shape: bf16[16,16], index: 4, kind: input, shape index: {}]   ;;  %s1411_s5 = inlined_call_operand.vmem [shape: f32[1,16], index: 5, kind: input, shape index: {}]   ;;  %s1412_s6 = inlined_call_operand.vmem [shape: bf16[16,8], index: 6, kind: output, shape index: {0}]   ;;  %s1413_s7 = inlined_call_operand.hbm [shape: bf16[16,16], index: 7, kind: output, shape index: {1}]  }
   0x1   :  { %1424 = sst [smem:[#allocation26_spill]] %s1406_s0 }
   0x2   :  { %1425 = sst [smem:[#allocation27_spill]] %s1407_s1 }
   0x3   :  { %1426 = sst [smem:[#allocation28_spill]] %s1408_s2 }
   0x4   :  { %1427 = sst [smem:[#allocation29_spill]] %s1413_s7 }
   0x5   :  { %13 = vsyncpa [#allocation5], 0 }
   0x6   :  { %15 = vsyncpa [#allocation5 + $0x1], 0 }
   0x7   :  { %16 = vsyncpa [#allocation8], 0 }
   0x8   :  { %17 = vsyncpa [#allocation6], 0 }
   0x9   :  { %19 = vsyncpa [#allocation6 + $0x1], 0  ;;  %s1181_s24 = smov 0   ;;  %s1183_s25 = smov 0  }
   0xa   :  { %s1185_s26 = smov 0   ;;  %s1187_s27 = smov 0  }
   0xb   :  { %s1189_s28 = smov 0   ;;  %s1191_s29 = smov 0  }
   0xc LB: > { %1428 = sst [smem:[#allocation18_spill]] %s1112_s24  ;;  %s1212_s30 = sadd.s32 4294967295, %s1132_s29   ;;  %s1132_s29 = sphi %s1191_s29, %s25_s29   ;;  %s1128_s28 = sphi %s1189_s28, %s1454_s28   ;;  %s1124_s27 = sphi %s1187_s27, %s1453_s27   ;;  %s1120_s26 = sphi %s1185_s26, %s1452_s26   ;;  %s1116_s25 = sphi %s1183_s25, %s1456_s25   ;;  %s1112_s24 = sphi %s1181_s24, %s1455_s24  }
   0xd   : > { %1429 = sst [smem:[#allocation19_spill]] %s1120_s26  ;;  %s747_s8 = sadd.s32 4294967294, %s1132_s29  }
   0xe   : > { %1430 = sst [smem:[#allocation20_spill]] %s1128_s28  ;;  %s37_s9 = sadd.s32 1, %s1128_s28 }
   0xf   : > { %1431 = sst [smem:[#allocation21_spill]] %s1132_s29  ;;  %s46_s10 = sadd.s32 1, %s1120_s26 }
  0x10   : > { %p39_p0 = scmp.ge.s32.totalorder %s37_s9, 2  ;;  %p53_p1 = scmp.ne.s32.totalorder %s1120_s26, %s1116_s25 }
  0x11   : > { %p54_p2 = scmp.eq.s32.totalorder %s1132_s29, 0  ;;  %p59_p3 = scmp.ne.s32.totalorder %s1116_s25, %s1112_s24 }
  0x12   : > { %s1458_s9 = smov (%p39_p0, %s37_s9), 0  ;;  %p229_p5 = scmp.eq.s32.totalorder %s1212_s30, 1 }
  0x13   : > { %1432 = sst [smem:[#allocation22_spill]] %s1458_s9  ;;  %p1224_p4 = por %p54_p2, %p53_p1 }
  0x14   : > { %s41_s12 = ssub.s32 %s1128_s28, %s1458_s9  ;;  %p235_p6 = scmp.eq.s32.totalorder %s747_s8, 1 }
  0x15   : > { %p44_p7 = scmp.eq.s32.totalorder %s41_s12, 0  ;;  %p1231_p8 = por %p229_p5, %p53_p1 }
  0x16   : > { %p1238_p9 = por %p235_p6, %p59_p3  ;;  %p751_p10 = scmp.ge.s32.totalorder %s1132_s29, 2 }
  0x17   : > { %s1434_s13 = scalar_select %p1231_p8, 1, 0 }
  0x18   : > { %s1436_s14 = scalar_select %p1238_p9, 1, 0 }
  0x19   : > { %1435 = sst [smem:[#allocation23_spill]] %s1434_s13  ;;  %p821_p11 = scmp.lt.s32.totalorder %s1132_s29, 2 }
  0x1a   : > { %1437 = sst [smem:[#allocation24_spill]] %s1436_s14  ;;  %s289_s16 = sand.u32 1, %s1132_s29  }
  0x1b   : > { %s1243_s15 = scalar_select %p44_p7, %s1120_s26, %s46_s10  }
  0x1c   : > { %s291_s17 = sand.u32 1, %s1120_s26   ;;  %s1252_s19 = sshll.u32 %s1128_s28, 2 }
  0x1d   : > { %1438 = sst [smem:[#allocation25_spill]] %s1243_s15  ;;  %s1249_s18 = sshll.u32 %s291_s17, 2 }
  0x1e   : > { %s1439_s0 = sld [smem:[#allocation26_spill]]  ;;  %s293_s23 = scalar_lea.vmem [#allocation4], %s1249_s18 }
  0x1f   : > { %s302_s8 = sshll.u32 %s293_s23, 4  ;;  %p1261_p12 = pnand %p821_p11, %p1224_p4  ;;  %s303_s8 = int_to_ptr.vmem [resolvable:$true] %s302_s8 }
  0x20   : > { %p60_p13 = scmp.eq.s32.totalorder %s1212_s30, 0  ;;  %s1266_s17 = scalar_lea.sflag [#allocation5], %s289_s16 }
  0x21   : > { %p748_p1 = scmp.ge.s32.totalorder %s1132_s29, 1  ;;  %p242_p2 = scmp.lt.s32.totalorder %s1132_s29, 3 }
  0x22   : > { %p1276_p0 = por %p60_p13, %p59_p3  ;;  %s1442_s1 = sld [smem:[#allocation27_spill]] }
  0x23   : > { %p1285_p4 = pnand %p748_p1, %p242_p2  ;;  %s1134_s23 = smov [#allocation7]  }
  0x24   : > { %s298_s22 = scalar_lea.hbm %s1439_s0, %s1252_s19  ;;  %s1444_s2 = sld [smem:[#allocation28_spill]] }
  0x25   : > { %s300_s10 = sshll.u32 %s298_s22, 4  ;;  %p798_p3 = pneg %p1285_p4  ;;  %s301_s10 = int_to_ptr.hbm [resolvable:$true] %s300_s10 }
  0x26   : > { %808 = dma.hbm_to_vmem [thread:$0]  (!%p1261_p12), %s301_s10, 64, %s303_s8, %s1266_s17  }
  0x27   : > { %s258_s8 = sshll.u32 %s1134_s23, 4  ;;  %p1297_p5 = pnand %p798_p3, %p60_p13  ;;  %s259_s8 = int_to_ptr.vmem [resolvable:$true] %s258_s8 }
  0x28   : > { %s256_s22 = sshll.u32 %s1442_s1, 4  ;;  %s313_s1 = scalar_lea.vmem [#allocation9], %s1249_s18  ;;  %s257_s22 = int_to_ptr.hbm [resolvable:$true] %s256_s22 }
  0x29   : > { %s321_s23 = sshll.u32 %s313_s1, 4  ;;  %s1135_s28 = smov 64   ;;  %s322_s23 = int_to_ptr.vmem [resolvable:$true] %s321_s23 }
  0x2a   : > { %s317_s9 = scalar_lea.hbm %s1444_s2, %s1252_s19  ;;  %s1136_s15 = smov 4  }
  0x2b   : > { %s319_s21 = sshll.u32 %s317_s9, 4  ;;  %s270_s2 = sshll.u32 %s1410_s4, 4  ;;  %s320_s21 = int_to_ptr.hbm [resolvable:$true] %s319_s21  ;;  %s271_s2 = int_to_ptr.hbm [resolvable:$true] %s270_s2 }
  0x2c   : > { %801 = dma.hbm_to_vmem [thread:$0]  (!%p1297_p5), %s257_s22, 128, %s259_s8, [#allocation8], %s1135_s28, %s1135_s28, %s1136_s15  }
  0x2d   : > { %811 = dma.hbm_to_vmem [thread:$0]  (!%p1261_p12), %s320_s21, 64, %s322_s23, %s1266_s17  }
  0x2e   : > { %s1137_s26 = smov [#allocation11]   ;;  %s336_s14 = scalar_lea.hbm %s1409_s3, %s1252_s19 }
  0x2f   : > { %s272_s9 = sshll.u32 %s1137_s26, 4  ;;  %s332_s24 = scalar_lea.vmem [#allocation10], %s1249_s18  ;;  %s273_s9 = int_to_ptr.vmem [resolvable:$true] %s272_s9 }
  0x30   : > { %804 = dma.hbm_to_vmem [thread:$0]  (!%p1297_p5), %s271_s2, 128, %s273_s9, [#allocation8], %s1135_s28, %s1135_s28, %s1136_s15  }
  0x31   : > { %s340_s13 = sshll.u32 %s332_s24, 4  ;;  %s338_s7 = sshll.u32 %s336_s14, 4  ;;  %s341_s13 = int_to_ptr.vmem [resolvable:$true] %s340_s13  ;;  %s339_s7 = int_to_ptr.hbm [resolvable:$true] %s338_s7 }
  0x32   : > { %814 = dma.hbm_to_vmem [thread:$0]  (!%p1261_p12), %s339_s7, 64, %s341_s13, %s1266_s17  }
  0x33   : > { %349 = sbr.rel (%p1285_p4) target bundleno = 920 (0x398), region = 44  ;;  %s351_s26 = sand.u32 (!%p1285_p4), 1, %s1212_s30  }
  0x34   : > { %s353_s2 = sand.u32 (!%p1285_p4), 1, %s1116_s25   ;;  %s352_s29 = scalar_lea.sflag (!%p1285_p4), [#allocation5], %s351_s26 }
  0x35   : > { %s1326_s28 = sshll.u32 (!%p1285_p4), %s353_s2, 2 }
  0x36   : > { %s355_s24 = scalar_lea.vmem (!%p1285_p4), [#allocation4], %s1326_s28 }
  0x38   : > { %1091 = dma.done.wait (%p1276_p0), %s352_s29, 64  }
  0x39   : > { %1093 = vsyncadd (%p1276_p0), %s352_s29, 4294967232 }
  0x3a   : > { %1095 = dma.done.wait (%p60_p13), [#allocation8], 128  }
  0x3b   : > { %1097 = vsyncadd (%p60_p13), [#allocation8], 4294967168  ;;  %s370_s7 = scalar_lea.vmem [#allocation9], %s1326_s28 }
  0x3c   : > { %1099 = dma.done.wait (%p1276_p0), %s352_s29, 128  }
  0x3d   : > { %1101 = vsyncadd (%p1276_p0), %s352_s29, 4294967168  ;;  %s380_s13 = scalar_lea.vmem [#allocation10], %s1326_s28 }
  0x3e   : > { %1103 = dma.done.wait (%p60_p13), [#allocation8], 128  }
  0x3f   : > { %1105 = vsyncadd (%p60_p13), [#allocation8], 4294967168  ;;  %vm441_vm0 = vcmask 130048   ;;  %vm443_vm1 = vcmask 7168   ;;  %v1138_v0 = vmov 0.0   ;;  %v780_v2 = vld [vmem:[#allocation7] sm:$0xff] }
  0x40   : > { %442 = vst.msk [vmem:[#allocation2] sm:$0xff] %vm441_vm0, %v1138_v0  ;;  %v445_v1 = vld [vmem:[%s355_s24] sm:$0xf]  ;;  %466 = vmatpush.bf16.msra.mxu0 %v780_v2  ;;  %v1139_v5 = vmov 0   ;;  %v489_v17 = vld [vmem:[%s370_s7] sm:$0xf] }
  0x41   : > { %444 = vst.msk [vmem:[#allocation3] sm:$0xff] %vm443_vm1, %v1138_v0  ;;  %v475_v3 = vunpack.c.l.bf16 %v445_v1  ;;  %880 = vset.pattern.permute.xlu0 %v1139_v5  ;;  %v781_v16 = vld [vmem:[#allocation11] sm:$0xff]  ;;  %v490_v18 = vunpack.c.l.bf16 %v489_v17  ;;  %p432_p6 = scmp.lt.s32.totalorder %s1124_s27, 1  ;;  %v881_v24 = vld [vmem:[%s1411_s5] ss:$0 sm:$0xff]  ;;  %vm528_vm2 = vcmask 130112  }
  0x42   : > { %521 = vmatpush.bf16.msra.mxu1 %v781_v16  ;;  %vm554_vm3 = vcmask 60416   ;;  %s1140_s20 = smov 120   ;;  %vm539_vm4 = vcmask 64512   ;;  %v550_v40 = vld [vmem:[%s380_s13] sm:$0xf]  ;;  %s777_s22 = sshll.u32 %s1124_s27, 2 }
  0x43   : > { %v476_v4 = vsel %vm441_vm0, %v475_v3, 0.0  ;;  %770 = vmatmul.msk.bf16.vlgmr.msra.gmra.mxu0 %vm441_vm0, %v445_v1  ;;  %s433_s30 = scalar_select %p432_p6, %s1124_s27, 1  ;;  %v551_v41 = vunpack.c.l.bf16 %v550_v40  ;;  %vm557_vm5 = vcmask 125952  }
  0x44   : > { %477 = vadd.xlane.f32.xlu0 %v476_v4  ;;  %s1446_s11 = sld [smem:[#allocation29_spill]]  ;;  %s430_s0 = scalar_lea.vmem [#allocation12], %s1326_s28 }
  0x45   : > { %s765_s18 = sshll.u32 %s433_s30, 2  ;;  %s579_s10 = sshll.u32 %s430_s0, 4  ;;  %s580_s10 = int_to_ptr.vmem [resolvable:$true] %s579_s10 }
  0x46   : > { %s435_s17 = scalar_lea.vmem %s1412_s6, %s765_s18  ;;  %s564_s1 = scalar_lea.sflag [#allocation6], %s353_s2 }
  0x47   : > { %v446_v9 = vld [vmem:[#allocation2] sm:$0xff] }
  0x48   : > { %v474_v6 = vld [vmem:[#allocation3] sm:$0xff] }
  0x4a   : > { %s577_s21 = scalar_lea.hbm %s1446_s11, %s777_s22  ;;  %s1058_s28 = scalar_lea.hbm %s1446_s11, 8 }
  0x4b   : > { %s581_s9 = sshll.u32 %s577_s21, 4  ;;  %s582_s9 = int_to_ptr.hbm [resolvable:$true] %s581_s9 }
  0x4c   : > { %s1052_s27 = sshra.s32 %s582_s9, 4  ;;  %s1053_s27 = int_to_ptr.hbm [resolvable:$true] %s1052_s27 }
  0x4d   : > { %s1054_s26 = scalar_lea.hbm %s1053_s27, 4  ;;  %p1059_p13 = scmp.lt.s32.totalorder %s1053_s27, %s1446_s11 }
  0x4e   : > { %p1055_p7 = scmp.ne.s32.totalorder %s1053_s27, %s1054_s26  ;;  %p1060_p0 = scmp.lt.s32.totalorder %s1058_s28, %s1054_s26 }
  0x50   : > { %p1056_p11 = pnand %p1055_p7, %p1231_p8  ;;  %p1061_p1 = por %p1060_p0, %p1059_p13 }
  0x52   : > { %p1057_p12 = pneg %p1056_p11 }
  0x54   : > { %p1062_p2 = pnand %p1061_p1, %p1057_p12 }
  0xb7   : > { %v478_v7 = vpop.xlane.xlu0 %477 }
  0xb8   : > { %v479_v8 = vadd.f32 %v478_v7, %v474_v6 }
  0xba   : > { %481 = vst.msk [vmem:[#allocation3] sm:$0xff] %vm443_vm1, %v479_v8 }
  0xc0   : > { %v468_v12 = vpop.f32.mrf.mxu0 }
  0xc1   : > { %v485_v10 = vld [vmem:[#allocation3] sm:$0xff]  ;;  %v472_v13 = vadd.f32 %v468_v12, %v446_v9 }
  0xc2   : > { %v486_v11 = vadd.f32 1.0, %v485_v10 }
  0xc3   : > { %473 = vst.msk [vmem:[#allocation2] sm:$0xff] %vm441_vm0, %v472_v13 }
  0xc4   : > { %882 = vrcp.f32 %v486_v11 }
  0xc8   : > { %v470_v15 = vpop.f32.mrf.mxu0 }
  0xca   : > { %v883_v14 = vpop.eup %882  ;;  %v488_v19 = vld [vmem:[#allocation2] sm:$0xff] }
  0xcb   : > { %494 = vperm.xlu0 %880, %v883_v14   ;;  %v491_v20 = vadd.f32 %v490_v18, %v488_v19 }
 0x13d   : > { %v495_v21 = vpop.permute.xlu0 %494 }
 0x13e   : > { %v497_v22 = vmul.f32 %v495_v21, %v491_v20 }
 0x140   : > { %v498_v23 = vpack.c.bf16 %v497_v22, %v497_v22 }
 0x142   : > { %775 = vmatmul.msk.bf16.vlgmr.msra.gmra.mxu1 %vm441_vm0, %v498_v23 }
 0x1bf   : > { %v523_v25 = vpop.f32.mrf.mxu1 }
 0x1c0   : > { %v524_v26 = vadd.f32 %v881_v24, %v523_v25 }
 0x1c2   : > { %v527_v27 = vmax.f32 %v524_v26, 0.0 }
 0x1c4   : > { %v553_v28 = vpack.c.bf16 %v527_v27, %v527_v27  ;;  %v529_v29 = vsel %vm528_vm2, %v527_v27, -inf }
 0x1c5   : > { %530 = vmax.xlane.f32.xlu1 %v529_v29 }
 0x1c6   : > { %555 = vst.msk [vmem:[%s435_s17] sm:$0xf] %vm554_vm3, %v553_v28 }
 0x1c7   : > { %v525_v30 = vpop.f32.mrf.mxu1 }
 0x238   : > { %v531_v31 = vpop.xlane.xlu1 %530 }
 0x239   : > { %v532_v32 = vsub.f32 %v527_v27, %v531_v31 }
 0x23b   : > { %v533_v33 = vmul.f32 1.442695, %v532_v32 }
 0x23d   : > { %884 = vpow2.f32 %v533_v33 }
 0x243   : > { %v885_v34 = vpop.eup %884 }
 0x244   : > { %536 = vrot.lane.b32.xlu1 %v885_v34, %s1140_s20 }
 0x2b6   : > { %v537_v35 = vpop.permute.xlu1 %536 }
 0x2b7   : > { %v540_v36 = vsel %vm539_vm4, %v537_v35, 0.0 }
 0x2b8   : > { %541 = vadd.xlane.f32.xlu2 %v540_v36 }
 0x32b   : > { %v542_v37 = vpop.xlane.xlu2 %541 }
 0x32c   : > { %886 = vrcp.f32 %v542_v37 }
 0x332   : > { %v887_v38 = vpop.eup %886 }
 0x333   : > { %v544_v39 = vmul.f32 %v887_v38, %v885_v34 }
 0x335   : > { %546 = vrot.lane.b32.xlu2 %v544_v39, %s1140_s20 }
 0x38f   : > { %v547_v42 = vpop.permute.xlu2 %546 }
 0x390   : > { %v549_v43 = vsel %vm539_vm4, %v547_v42, %v544_v39 }
 0x391   : > { %v552_v44 = vmul.f32 %v551_v41, %v549_v43 }
 0x393   : > { %v556_v45 = vpack.c.bf16 %v552_v44, %v552_v44 }
 0x395   : > { %558 = vst.msk [vmem:[%s430_s0] sm:$0xf] %vm557_vm5, %v556_v45 }
 0x396   : > { %1065 = shalt.err (!%p1062_p2)
}
 0x397   : > { %796 = dma.vmem_to_hbm [thread:$0]  (%p1231_p8), %s580_s10, 64, %s582_s9, %s564_s1  }
 0x398 PF: > { %s1448_s2 = sld [smem:[#allocation18_spill]]  ;;  %p816_p4 = pnand %p751_p10, %p1238_p9 }
 0x399   : > { %s1450_s14 = sld [smem:[#allocation21_spill]] }
 0x39a   : > { %p817_p3 = pneg %p816_p4 }
 0x39e   : > { %s600_s15 = sand.u32 1, %s1448_s2  }
 0x39f   : > { %s601_s18 = scalar_lea.sflag [#allocation6], %s600_s15 }
 0x3a0   : > { %1107 = dma.done.wait (%p817_p3), %s601_s18, 64  }
 0x3a1   : > { %1109 = vsyncadd (%p817_p3), %s601_s18, 4294967232  ;;  %s25_s29 = sadd.s32 1, %s1450_s14   ;;  %s1451_s19 = sld [smem:[#allocation19_spill]] }
 0x3a2   : > { %p22_p5 = scmp.ge.s32.totalorder %s25_s29, 4   ;;  %s1452_s26 = sld [smem:[#allocation25_spill]] }
 0x3a3   : > { %s1453_s27 = sld [smem:[#allocation20_spill]]  ;;  %s1455_s24 = smov %s1116_s25 }
 0x3a4   : > { %s1454_s28 = sld [smem:[#allocation22_spill]]  ;;  %24 = sbr.rel (!%p22_p5) target bundleno = 12 (0xc), region = 140 }
 0x3a7   : > { %s1456_s25 = smov %s1451_s19 }
 0x3a9   :  { %607 = vsyncpa [#allocation5], 1 }
 0x3aa   :  { %609 = vsyncpa [#allocation5 + $0x1], 1 }
 0x3ab   :  { %610 = vsyncpa [#allocation8], 1 }
 0x3ac   :  { %611 = vsyncpa [#allocation6], 1 }
 0x3ad   :  { %613 = vsyncpa [#allocation6 + $0x1], 1 }

</bundles_post_ra>
